<compile_context>
chip_gen: v5e
topology: v5e:2x2
jax: 0.10.0
libtpu: 0.0.40
codegen_flags: <defaults>
</compile_context>

<pallas_src>
import jax
import jax.numpy as jnp
from jax import lax
from jax.experimental import pallas as pl
from jax.experimental.pallas import tpu as pltpu


# contract x's last dim with w's last dim:  (T, in) x (latent, in) -> (T, latent)
_DN = (((1,), (1,)), ((), ()))


def _qkv_kernel(xt_ref, xf_ref, wq_ref, wk_ref, wv_ref,
                bq_ref, bk_ref, bv_ref, q_ref, k_ref, v_ref):
    xt = xt_ref[0]            # (T_to, to_dim)
    xf = xf_ref[0]            # (T_from, from_dim)  -- loaded once, used twice

    q = lax.dot_general(xt, wq_ref[...], _DN, preferred_element_type=jnp.float32)
    q_ref[0] = (q + bq_ref[...]).astype(q_ref.dtype)

    k = lax.dot_general(xf, wk_ref[...], _DN, preferred_element_type=jnp.float32)
    k_ref[0] = (k + bk_ref[...]).astype(k_ref.dtype)

    v = lax.dot_general(xf, wv_ref[...], _DN, preferred_element_type=jnp.float32)
    v_ref[0] = (v + bv_ref[...]).astype(v_ref.dtype)


@jax.jit
def tokens_to_qkv(X_to, X_from, wq, bq, wk, bk, wv, bv):
    """X_to: (B, T_to, to_dim), X_from: (B, T_from, from_dim).
    Weights in PyTorch layout: w*: (latent_dim, in_dim), b*: (latent_dim,)."""
    B, T_to, to_dim = X_to.shape
    _, T_from, from_dim = X_from.shape
    latent_dim = wq.shape[0]

    bq2 = bq.reshape(1, latent_dim)
    bk2 = bk.reshape(1, latent_dim)
    bv2 = bv.reshape(1, latent_dim)

    batch_spec = lambda T, D: pl.BlockSpec((1, T, D), lambda b: (b, 0, 0))
    const_spec = lambda R, C: pl.BlockSpec((R, C), lambda b: (0, 0))

    return pl.pallas_call(
        _qkv_kernel,
        grid=(B,),
        in_specs=[
            batch_spec(T_to, to_dim),            # X_to
            batch_spec(T_from, from_dim),        # X_from
            const_spec(latent_dim, to_dim),      # Wq
            const_spec(latent_dim, from_dim),    # Wk
            const_spec(latent_dim, from_dim),    # Wv
            const_spec(1, latent_dim),           # bq
            const_spec(1, latent_dim),           # bk
            const_spec(1, latent_dim),           # bv
        ],
        out_specs=[
            batch_spec(T_to, latent_dim),        # Q
            batch_spec(T_from, latent_dim),      # K
            batch_spec(T_from, latent_dim),      # V
        ],
        out_shape=(
            jax.ShapeDtypeStruct((B, T_to, latent_dim), jnp.float32),
            jax.ShapeDtypeStruct((B, T_from, latent_dim), jnp.float32),
            jax.ShapeDtypeStruct((B, T_from, latent_dim), jnp.float32),
        ),
        compiler_params=pltpu.CompilerParams(
            dimension_semantics=("parallel",),
        ),
    )(X_to, X_from, wq, wk, wv, bq2, bk2, bv2)


# ----------------------------------------------------------------------------
# Pure-JAX reference for correctness check
# ----------------------------------------------------------------------------
def tokens_to_qkv_ref(X_to, X_from, wq, bq, wk, bk, wv, bv):
    Q = X_to @ wq.T + bq
    K = X_from @ wk.T + bk
    V = X_from @ wv.T + bv
    return Q, K, V


if __name__ == "__main__":
    # Small shapes consistent with the module's forward.
    B, T_to, T_from = 2, 8, 16
    to_dim, from_dim, latent_dim = 32, 64, 128   # latent_dim multiple of 128 -> lane-dense stores

    key = jax.random.PRNGKey(0)
    kx, ky, k1, k2, k3, k4, k5, k6 = jax.random.split(key, 8)
    X_to = jax.random.normal(kx, (B, T_to, to_dim), dtype=jnp.float32)
    X_from = jax.random.normal(ky, (B, T_from, from_dim), dtype=jnp.float32)

    def linear_init(kw, kb, out_d, in_d):
        # deterministic nn.Linear(in_d, out_d)-style init
        bound = 1.0 / (in_d ** 0.5)
        w = jax.random.uniform(kw, (out_d, in_d), jnp.float32, -bound, bound)
        b = jax.random.uniform(kb, (out_d,), jnp.float32, -bound, bound)
        return w, b

    wq, bq = linear_init(k1, k2, latent_dim, to_dim)
    wk, bk = linear_init(k3, k4, latent_dim, from_dim)
    wv, bv = linear_init(k5, k6, latent_dim, from_dim)

    Q, K, V = tokens_to_qkv(X_to, X_from, wq, bq, wk, bk, wv, bv)
    jax.block_until_ready((Q, K, V))

    Q_r, K_r, V_r = tokens_to_qkv_ref(X_to, X_from, wq, bq, wk, bk, wv, bv)
    assert jnp.allclose(Q, Q_r, atol=1e-4, rtol=1e-4)
    assert jnp.allclose(K, K_r, atol=1e-4, rtol=1e-4)
    assert jnp.allclose(V, V_r, atol=1e-4, rtol=1e-4)

    print("KERNEL_OK")
</pallas_src>

<mosaic_0001>
module attributes {stable_mosaic.version = 11 : i64} {
  func.func @_qkv_kernel(%arg0: i32, %arg1: memref<1x8x32xf32, #tpu.memory_space<vmem>>, %arg2: memref<1x16x64xf32, #tpu.memory_space<vmem>>, %arg3: memref<128x32xf32, #tpu.memory_space<vmem>>, %arg4: memref<128x64xf32, #tpu.memory_space<vmem>>, %arg5: memref<128x64xf32, #tpu.memory_space<vmem>>, %arg6: memref<1x128xf32, #tpu.memory_space<vmem>>, %arg7: memref<1x128xf32, #tpu.memory_space<vmem>>, %arg8: memref<1x128xf32, #tpu.memory_space<vmem>>, %arg9: memref<1x8x128xf32, #tpu.memory_space<vmem>>, %arg10: memref<1x16x128xf32, #tpu.memory_space<vmem>>, %arg11: memref<1x16x128xf32, #tpu.memory_space<vmem>>) attributes {dimension_semantics = [#tpu.dimension_semantics<parallel>], iteration_bounds = array<i64: 2>, scalar_prefetch = 0 : i64, scratch_operands = 0 : i64, tpu.core_type = #tpu.core_type<tc>, window_params = [{transform_indices = @transform_0, window_bounds = array<i64: 1, 8, 32>}, {transform_indices = @transform_1, window_bounds = array<i64: 1, 16, 64>}, {pipeline_mode = #tpu.pipeline_mode<synchronous>, transform_indices = @transform_2, window_bounds = array<i64: 128, 32>}, {pipeline_mode = #tpu.pipeline_mode<synchronous>, transform_indices = @transform_3, window_bounds = array<i64: 128, 64>}, {pipeline_mode = #tpu.pipeline_mode<synchronous>, transform_indices = @transform_4, window_bounds = array<i64: 128, 64>}, {pipeline_mode = #tpu.pipeline_mode<synchronous>, transform_indices = @transform_5, window_bounds = array<i64: 1, 128>}, {pipeline_mode = #tpu.pipeline_mode<synchronous>, transform_indices = @transform_6, window_bounds = array<i64: 1, 128>}, {pipeline_mode = #tpu.pipeline_mode<synchronous>, transform_indices = @transform_7, window_bounds = array<i64: 1, 128>}, {transform_indices = @transform_8, window_bounds = array<i64: 1, 8, 128>}, {transform_indices = @transform_9, window_bounds = array<i64: 1, 16, 128>}, {transform_indices = @transform_10, window_bounds = array<i64: 1, 16, 128>}]} {
    %c0 = arith.constant 0 : index
    %c0_0 = arith.constant 0 : index
    %c0_1 = arith.constant 0 : index
    %0 = vector.load %arg1[%c0, %c0_0, %c0_1] : memref<1x8x32xf32, #tpu.memory_space<vmem>>, vector<1x8x32xf32>
    %1 = vector.shape_cast %0 : vector<1x8x32xf32> to vector<8x32xf32>
    %c0_2 = arith.constant 0 : index
    %c0_3 = arith.constant 0 : index
    %c0_4 = arith.constant 0 : index
    %2 = vector.load %arg2[%c0_2, %c0_3, %c0_4] : memref<1x16x64xf32, #tpu.memory_space<vmem>>, vector<1x16x64xf32>
    %3 = vector.shape_cast %2 : vector<1x16x64xf32> to vector<16x64xf32>
    %c0_5 = arith.constant 0 : index
    %c0_6 = arith.constant 0 : index
    %4 = vector.load %arg3[%c0_5, %c0_6] : memref<128x32xf32, #tpu.memory_space<vmem>>, vector<128x32xf32>
    %cst = arith.constant dense<0.000000e+00> : vector<8x128xf32>
    %5 = tpu.matmul %1, %4, %cst {dimension_numbers = #tpu.dot_dimension_numbers<[1], [1], [0], [0], [0, 0, 1, 0], [], []>} : vector<8x32xf32>, vector<128x32xf32>, vector<8x128xf32> -> vector<8x128xf32>
    %c0_7 = arith.constant 0 : index
    %c0_8 = arith.constant 0 : index
    %6 = vector.load %arg6[%c0_7, %c0_8] : memref<1x128xf32, #tpu.memory_space<vmem>>, vector<1x128xf32>
    %7 = vector.broadcast %6 : vector<1x128xf32> to vector<8x128xf32>
    %8 = arith.addf %5, %7 : vector<8x128xf32>
    %c0_9 = arith.constant 0 : index
    %c0_10 = arith.constant 0 : index
    %c0_11 = arith.constant 0 : index
    %9 = vector.load %arg9[%c0_9, %c0_10, %c0_11] : memref<1x8x128xf32, #tpu.memory_space<vmem>>, vector<1x8x128xf32>
    %10 = vector.shape_cast %9 : vector<1x8x128xf32> to vector<8x128xf32>
    %11 = vector.shape_cast %8 : vector<8x128xf32> to vector<1x8x128xf32>
    tpu.vector_store %arg9[%c0_9, %c0_10, %c0_11], %11 {strides = array<i32>} : memref<1x8x128xf32, #tpu.memory_space<vmem>>, vector<1x8x128xf32>,
    %c0_12 = arith.constant 0 : index
    %c0_13 = arith.constant 0 : index
    %12 = vector.load %arg4[%c0_12, %c0_13] : memref<128x64xf32, #tpu.memory_space<vmem>>, vector<128x64xf32>
    %cst_14 = arith.constant dense<0.000000e+00> : vector<16x128xf32>
    %13 = tpu.matmul %3, %12, %cst_14 {dimension_numbers = #tpu.dot_dimension_numbers<[1], [1], [0], [0], [0, 0, 1, 0], [], []>} : vector<16x64xf32>, vector<128x64xf32>, vector<16x128xf32> -> vector<16x128xf32>
    %c0_15 = arith.constant 0 : index
    %c0_16 = arith.constant 0 : index
    %14 = vector.load %arg7[%c0_15, %c0_16] : memref<1x128xf32, #tpu.memory_space<vmem>>, vector<1x128xf32>
    %15 = vector.broadcast %14 : vector<1x128xf32> to vector<16x128xf32>
    %16 = arith.addf %13, %15 : vector<16x128xf32>
    %c0_17 = arith.constant 0 : index
    %c0_18 = arith.constant 0 : index
    %c0_19 = arith.constant 0 : index
    %17 = vector.load %arg10[%c0_17, %c0_18, %c0_19] : memref<1x16x128xf32, #tpu.memory_space<vmem>>, vector<1x16x128xf32>
    %18 = vector.shape_cast %17 : vector<1x16x128xf32> to vector<16x128xf32>
    %19 = vector.shape_cast %16 : vector<16x128xf32> to vector<1x16x128xf32>
    tpu.vector_store %arg10[%c0_17, %c0_18, %c0_19], %19 {strides = array<i32>} : memref<1x16x128xf32, #tpu.memory_space<vmem>>, vector<1x16x128xf32>,
    %c0_20 = arith.constant 0 : index
    %c0_21 = arith.constant 0 : index
    %20 = vector.load %arg5[%c0_20, %c0_21] : memref<128x64xf32, #tpu.memory_space<vmem>>, vector<128x64xf32>
    %cst_22 = arith.constant dense<0.000000e+00> : vector<16x128xf32>
    %21 = tpu.matmul %3, %20, %cst_22 {dimension_numbers = #tpu.dot_dimension_numbers<[1], [1], [0], [0], [0, 0, 1, 0], [], []>} : vector<16x64xf32>, vector<128x64xf32>, vector<16x128xf32> -> vector<16x128xf32>
    %c0_23 = arith.constant 0 : index
    %c0_24 = arith.constant 0 : index
    %22 = vector.load %arg8[%c0_23, %c0_24] : memref<1x128xf32, #tpu.memory_space<vmem>>, vector<1x128xf32>
    %23 = vector.broadcast %22 : vector<1x128xf32> to vector<16x128xf32>
    %24 = arith.addf %21, %23 : vector<16x128xf32>
    %c0_25 = arith.constant 0 : index
    %c0_26 = arith.constant 0 : index
    %c0_27 = arith.constant 0 : index
    %25 = vector.load %arg11[%c0_25, %c0_26, %c0_27] : memref<1x16x128xf32, #tpu.memory_space<vmem>>, vector<1x16x128xf32>
    %26 = vector.shape_cast %25 : vector<1x16x128xf32> to vector<16x128xf32>
    %27 = vector.shape_cast %24 : vector<16x128xf32> to vector<1x16x128xf32>
    tpu.vector_store %arg11[%c0_25, %c0_26, %c0_27], %27 {strides = array<i32>} : memref<1x16x128xf32, #tpu.memory_space<vmem>>, vector<1x16x128xf32>,
    return
  }
  func.func @transform_0(%arg0: i32) -> (i32, i32, i32) {
    %c0_i32 = arith.constant 0 : i32
    %c0_i32_0 = arith.constant 0 : i32
    %c0_i32_1 = arith.constant 0 : i32
    return %arg0, %c0_i32, %c0_i32_0 : i32, i32, i32
  }
  func.func @transform_1(%arg0: i32) -> (i32, i32, i32) {
    %c0_i32 = arith.constant 0 : i32
    %c0_i32_0 = arith.constant 0 : i32
    %c0_i32_1 = arith.constant 0 : i32
    return %arg0, %c0_i32, %c0_i32_0 : i32, i32, i32
  }
  func.func @transform_2(%arg0: i32) -> (i32, i32) {
    %c0_i32 = arith.constant 0 : i32
    %c0_i32_0 = arith.constant 0 : i32
    %c0_i32_1 = arith.constant 0 : i32
    return %c0_i32, %c0_i32_0 : i32, i32
  }
  func.func @transform_3(%arg0: i32) -> (i32, i32) {
    %c0_i32 = arith.constant 0 : i32
    %c0_i32_0 = arith.constant 0 : i32
    %c0_i32_1 = arith.constant 0 : i32
    return %c0_i32, %c0_i32_0 : i32, i32
  }
  func.func @transform_4(%arg0: i32) -> (i32, i32) {
    %c0_i32 = arith.constant 0 : i32
    %c0_i32_0 = arith.constant 0 : i32
    %c0_i32_1 = arith.constant 0 : i32
    return %c0_i32, %c0_i32_0 : i32, i32
  }
  func.func @transform_5(%arg0: i32) -> (i32, i32) {
    %c0_i32 = arith.constant 0 : i32
    %c0_i32_0 = arith.constant 0 : i32
    %c0_i32_1 = arith.constant 0 : i32
    return %c0_i32, %c0_i32_0 : i32, i32
  }
  func.func @transform_6(%arg0: i32) -> (i32, i32) {
    %c0_i32 = arith.constant 0 : i32
    %c0_i32_0 = arith.constant 0 : i32
    %c0_i32_1 = arith.constant 0 : i32
    return %c0_i32, %c0_i32_0 : i32, i32
  }
  func.func @transform_7(%arg0: i32) -> (i32, i32) {
    %c0_i32 = arith.constant 0 : i32
    %c0_i32_0 = arith.constant 0 : i32
    %c0_i32_1 = arith.constant 0 : i32
    return %c0_i32, %c0_i32_0 : i32, i32
  }
  func.func @transform_8(%arg0: i32) -> (i32, i32, i32) {
    %c0_i32 = arith.constant 0 : i32
    %c0_i32_0 = arith.constant 0 : i32
    %c0_i32_1 = arith.constant 0 : i32
    return %arg0, %c0_i32, %c0_i32_0 : i32, i32, i32
  }
  func.func @transform_9(%arg0: i32) -> (i32, i32, i32) {
    %c0_i32 = arith.constant 0 : i32
    %c0_i32_0 = arith.constant 0 : i32
    %c0_i32_1 = arith.constant 0 : i32
    return %arg0, %c0_i32, %c0_i32_0 : i32, i32, i32
  }
  func.func @transform_10(%arg0: i32) -> (i32, i32, i32) {
    %c0_i32 = arith.constant 0 : i32
    %c0_i32_0 = arith.constant 0 : i32
    %c0_i32_1 = arith.constant 0 : i32
    return %arg0, %c0_i32, %c0_i32_0 : i32, i32, i32
  }
}

</mosaic_0001>

<bundles_post_ra>
// kernel: tokens_to_qkv.1
= control target key start
LH: loop header
LB: loop body
LE: loop exit
PB: predicated region body
PF: predicated region fallthrough
CT: control target
= control target key end

     0   :  { %s1573_s0 = inlined_call_operand.vmem [shape: f32[2,8,32], index: 0, kind: input, shape index: {}]   ;;  %s1574_s1 = inlined_call_operand.vmem [shape: f32[2,16,64], index: 1, kind: input, shape index: {}]   ;;  %s1575_s2 = inlined_call_operand.vmem [shape: f32[128,32], index: 2, kind: input, shape index: {}]   ;;  %s1576_s3 = inlined_call_operand.vmem [shape: f32[128,64], index: 3, kind: input, shape index: {}]   ;;  %s1577_s4 = inlined_call_operand.vmem [shape: f32[128,64], index: 4, kind: input, shape index: {}]   ;;  %s1578_s5 = inlined_call_operand.vmem [shape: f32[1,128], index: 5, kind: input, shape index: {}]   ;;  %s1579_s6 = inlined_call_operand.vmem [shape: f32[1,128], index: 6, kind: input, shape index: {}]   ;;  %s1580_s7 = inlined_call_operand.vmem [shape: f32[1,128], index: 7, kind: input, shape index: {}]   ;;  %s1581_s8 = inlined_call_operand.hbm [shape: f32[2,8,128], index: 8, kind: output, shape index: {0}]   ;;  %s1582_s9 = inlined_call_operand.hbm [shape: f32[2,16,128], index: 9, kind: output, shape index: {1}]   ;;  %s1583_s10 = inlined_call_operand.hbm [shape: f32[2,16,128], index: 10, kind: output, shape index: {2}]  }
   0x1   :  { %1587 = sst [smem:[#allocation10_spill]] %s1573_s0 }
   0x2   :  { %1588 = sst [smem:[#allocation11_spill]] %s1574_s1 }
   0x3   :  { %1589 = sst [smem:[#allocation12_spill]] %s1575_s2 }
   0x4   :  { %1590 = sst [smem:[#allocation13_spill]] %s1576_s3 }
   0x5   :  { %1591 = sst [smem:[#allocation14_spill]] %s1577_s4 }
   0x6   :  { %16 = vsyncpa [#allocation3], 0 }
   0x7   :  { %18 = vsyncpa [#allocation3 + $0x1], 0 }
   0x8   :  { %19 = vsyncpa [#allocation5], 0 }
   0x9   :  { %21 = vsyncpa [#allocation5 + $0x1], 0  ;;  %s1203_s13 = smov 0   ;;  %s1205_s14 = smov 0  }
   0xa   :  { %s1207_s15 = smov 0   ;;  %s1209_s16 = smov 0  }
   0xb LB: > { %s1224_s17 = sadd.s32 4294967295, %s1144_s16   ;;  %s1584_s18 = sadd.s32 4294967294, %s1144_s16   ;;  %s1144_s16 = sphi %s1209_s16, %s1607_s16   ;;  %s1140_s15 = sphi %s1207_s15, %s1606_s15   ;;  %s1136_s14 = sphi %s1205_s14, %s1605_s14   ;;  %s1132_s13 = sphi %s1203_s13, %s1604_s13  }
   0xc   : > { %s1228_s19 = sadd.s32 1, %s1144_s16   ;;  %s212_s20 = sadd.s32 1, %s1140_s15 }
   0xd   : > { %s209_s21 = ssub.s32 %s1144_s16, %s1228_s19  ;;  %p222_p0 = scmp.ne.s32.totalorder %s1140_s15, %s1136_s14 }
   0xe   : > { %p210_p1 = scmp.eq.s32.totalorder %s209_s21, 0  ;;  %p223_p2 = scmp.eq.s32.totalorder %s1224_s17, 1 }
   0xf   : > { %p228_p3 = scmp.ne.s32.totalorder %s1136_s14, %s1132_s13  ;;  %p229_p4 = scmp.eq.s32.totalorder %s1584_s18, 1 }
  0x10   : > { %s1241_s22 = scalar_select %p210_p1, %s1140_s15, %s212_s20  }
  0x11   : > { %p1243_p5 = por %p223_p2, %p222_p0  ;;  %p1247_p6 = por %p229_p4, %p228_p3 }
  0x12   : > { %1592 = sst [smem:[#allocation9_spill]] %s1241_s22  ;;  %p879_p7 = scmp.ge.s32.totalorder %s1144_s16, 1 }
  0x13   : > { %p332_p8 = scmp.lt.s32.totalorder %s1144_s16, 3 }
  0x15   : > { %p333_p9 = pnand %p879_p7, %p332_p8 }
  0x16   : > { %s1595_s4 = sld [smem:[#allocation14_spill]] (!%p333_p9)  ;;  %p384_p10 = scmp.lt.s32.totalorder (!%p333_p9), %s1224_s17, 1 }
  0x17   : > { %336 = sbr.rel (%p333_p9) target bundleno = 255 (0xff), region = 52  ;;  %s1596_s3 = sld [smem:[#allocation13_spill]] (!%p333_p9) }
  0x18   : > { %s1597_s2 = sld [smem:[#allocation12_spill]] (!%p333_p9)  ;;  %s1475_s18 = sand.u32 (!%p333_p9), 1, %s1136_s14  }
  0x19   : > { %s1598_s1 = sld [smem:[#allocation11_spill]] (!%p333_p9)  ;;  %s880_s22 = sshll.u32 (!%p333_p9), %s1475_s18, 3 }
  0x1a   : > { %s1599_s0 = sld [smem:[#allocation10_spill]] (!%p333_p9)  ;;  %s1042_s25 = scalar_lea.hbm (!%p333_p9), %s1581_s8, 16 }
  0x1c   : > { %vm509_vm0 = vcmask 523264   ;;  %v604_v0 = vld [vmem:[%s1595_s4 + $0x78] sm:$0xff]  ;;  %vm416_vm1 = vcmask 261120   ;;  %v603_v2 = vld [vmem:[%s1595_s4 + $0x70] sm:$0xff]  ;;  %v602_v6 = vld [vmem:[%s1595_s4 + $0x68] sm:$0xff]  ;;  %s385_s27 = scalar_select %p384_p10, %s1224_s17, 1 }
  0x1d   : > { %v504_v1 = vld [vmem:[%s1596_s3 + $0x78] sm:$0xff]  ;;  %921 = vmatpush.xpose.msk.msra.mxu2 %vm509_vm0, %v604_v0  ;;  %v503_v3 = vld [vmem:[%s1596_s3 + $0x70] sm:$0xff]  ;;  %v502_v7 = vld [vmem:[%s1596_s3 + $0x68] sm:$0xff] }
  0x1e   : > { %952 = vmatpush.xpose.msk.msra.mxu3 %vm509_vm0, %v504_v1  ;;  %903 = vmatpush.xpose.msk.msra.mxu1 %vm509_vm0, %v504_v1  ;;  %v411_v4 = vld [vmem:[%s1597_s2 + $0x78] sm:$0xff]  ;;  %v410_v5 = vld [vmem:[%s1597_s2 + $0x70] sm:$0xff]  ;;  %v409_v8 = vld [vmem:[%s1597_s2 + $0x68] sm:$0xff]  ;;  %s949_s21 = sshll.u32 %s385_s27, 4  ;;  %s883_s28 = sshll.u32 %s385_s27, 3 }
  0x1f   : > { %886 = vmatpush.xpose.msk.msra.mxu0 %vm416_vm1, %v411_v4  ;;  %v601_v9 = vld [vmem:[%s1595_s4 + $0x60] sm:$0xff]  ;;  %v600_v12 = vld [vmem:[%s1595_s4 + $0x58] sm:$0xff]  ;;  %v599_v15 = vld [vmem:[%s1595_s4 + $0x50] sm:$0xff]  ;;  %s392_s20 = scalar_lea.vmem %s1598_s1, %s949_s21  ;;  %s942_s21 = sshll.u32 %s1224_s17, 3 }
  0x20   : > { %v501_v10 = vld [vmem:[%s1596_s3 + $0x60] sm:$0xff]  ;;  %v500_v13 = vld [vmem:[%s1596_s3 + $0x58] sm:$0xff]  ;;  %v499_v16 = vld [vmem:[%s1596_s3 + $0x50] sm:$0xff]  ;;  %s387_s30 = scalar_lea.vmem %s1599_s0, %s883_s28  ;;  %s703_s12 = scalar_lea.hbm %s1581_s8, %s942_s21 }
  0x21   : > { %922 = vmatpush.xpose.msk.msra.mxu2 %vm509_vm0, %v603_v2  ;;  %v408_v11 = vld [vmem:[%s1597_s2 + $0x60] sm:$0xff]  ;;  %v407_v14 = vld [vmem:[%s1597_s2 + $0x58] sm:$0xff]  ;;  %v406_v17 = vld [vmem:[%s1597_s2 + $0x50] sm:$0xff]  ;;  %s1585_s27 = sshll.u32 %s1224_s17, 4  ;;  %s369_s0 = scalar_lea.vmem [#allocation2], %s880_s22 }
  0x22   : > { %953 = vmatpush.xpose.msk.msra.mxu3 %vm509_vm0, %v503_v3  ;;  %904 = vmatpush.xpose.msk.msra.mxu1 %vm509_vm0, %v503_v3  ;;  %v598_v18 = vld [vmem:[%s1595_s4 + $0x48] sm:$0xff]  ;;  %v597_v21 = vld [vmem:[%s1595_s4 + $0x40] sm:$0xff]  ;;  %v596_v24 = vld [vmem:[%s1595_s4 + $0x38] sm:$0xff]  ;;  %s705_s1 = sshll.u32 %s369_s0, 4  ;;  %s1495_s21 = scalar_lea.hbm %s1582_s9, %s1585_s27  ;;  %s706_s1 = int_to_ptr.vmem [resolvable:$true] %s705_s1 }
  0x23   : > { %887 = vmatpush.xpose.msk.msra.mxu0 %vm416_vm1, %v410_v5  ;;  %v498_v19 = vld [vmem:[%s1596_s3 + $0x48] sm:$0xff]  ;;  %v497_v22 = vld [vmem:[%s1596_s3 + $0x40] sm:$0xff]  ;;  %v496_v25 = vld [vmem:[%s1596_s3 + $0x38] sm:$0xff] }
  0x24   : > { %v405_v20 = vld [vmem:[%s1597_s2 + $0x48] sm:$0xff]  ;;  %v404_v23 = vld [vmem:[%s1597_s2 + $0x40] sm:$0xff]  ;;  %v403_v26 = vld [vmem:[%s1597_s2 + $0x38] sm:$0xff] }
  0x25   : > { %923 = vmatpush.xpose.msk.msra.mxu2 %vm509_vm0, %v602_v6  ;;  %v595_v27 = vld [vmem:[%s1595_s4 + $0x30] sm:$0xff]  ;;  %v594_v30 = vld [vmem:[%s1595_s4 + $0x28] sm:$0xff]  ;;  %v593_v33 = vld [vmem:[%s1595_s4 + $0x20] sm:$0xff] }
  0x26   : > { %954 = vmatpush.xpose.msk.msra.mxu3 %vm509_vm0, %v502_v7  ;;  %905 = vmatpush.xpose.msk.msra.mxu1 %vm509_vm0, %v502_v7  ;;  %v495_v28 = vld [vmem:[%s1596_s3 + $0x30] sm:$0xff]  ;;  %v494_v31 = vld [vmem:[%s1596_s3 + $0x28] sm:$0xff]  ;;  %v493_v34 = vld [vmem:[%s1596_s3 + $0x20] sm:$0xff] }
  0x27   : > { %888 = vmatpush.xpose.msk.msra.mxu0 %vm416_vm1, %v409_v8  ;;  %v402_v29 = vld [vmem:[%s1597_s2 + $0x30] sm:$0xff]  ;;  %v401_v32 = vld [vmem:[%s1597_s2 + $0x28] sm:$0xff]  ;;  %v400_v35 = vld [vmem:[%s1597_s2 + $0x20] sm:$0xff] }
  0x28   : > { %v592_v36 = vld [vmem:[%s1595_s4 + $0x18] sm:$0xff]  ;;  %v591_v39 = vld [vmem:[%s1595_s4 + $0x10] sm:$0xff]  ;;  %v590_v42 = vld [vmem:[%s1595_s4 + $0x8] sm:$0xff] }
  0x29   : > { %924 = vmatpush.xpose.msk.msra.mxu2 %vm509_vm0, %v601_v9  ;;  %v492_v37 = vld [vmem:[%s1596_s3 + $0x18] sm:$0xff]  ;;  %v491_v40 = vld [vmem:[%s1596_s3 + $0x10] sm:$0xff]  ;;  %v490_v43 = vld [vmem:[%s1596_s3 + $0x8] sm:$0xff] }
  0x2a   : > { %955 = vmatpush.xpose.msk.msra.mxu3 %vm509_vm0, %v501_v10  ;;  %906 = vmatpush.xpose.msk.msra.mxu1 %vm509_vm0, %v501_v10  ;;  %v399_v38 = vld [vmem:[%s1597_s2 + $0x18] sm:$0xff]  ;;  %v398_v41 = vld [vmem:[%s1597_s2 + $0x10] sm:$0xff]  ;;  %v397_v44 = vld [vmem:[%s1597_s2 + $0x8] sm:$0xff] }
  0x2b   : > { %889 = vmatpush.xpose.msk.msra.mxu0 %vm416_vm1, %v408_v11  ;;  %v589_v45 = vld [vmem:[%s1595_s4] sm:$0xff]  ;;  %v395_v49 = vld [vmem:[%s392_s20 + $0x8] sm:$0xff]  ;;  %s721_s4 = sshll.u32 %s1495_s21, 4  ;;  %s722_s4 = int_to_ptr.hbm [resolvable:$true] %s721_s4 }
  0x2c   : > { %v489_v46 = vld [vmem:[%s1596_s3] sm:$0xff]  ;;  %s687_s3 = sand.u32 1, %s1224_s17  }
  0x2d   : > { %925 = vmatpush.xpose.msk.msra.mxu2 %vm509_vm0, %v600_v12  ;;  %v396_v47 = vld [vmem:[%s1597_s2] sm:$0xff]  ;;  %s707_s2 = sshll.u32 %s703_s12, 4  ;;  %s683_s12 = scalar_lea.sflag [#allocation3], %s1475_s18  ;;  %s708_s2 = int_to_ptr.hbm [resolvable:$true] %s707_s2 }
  0x2e   : > { %956 = vmatpush.xpose.msk.msra.mxu3 %vm509_vm0, %v500_v13  ;;  %907 = vmatpush.xpose.msk.msra.mxu1 %vm509_vm0, %v500_v13  ;;  %v394_v48 = vld [vmem:[%s392_s20] sm:$0xff]  ;;  %s1586_s20 = sshll.u32 %s1475_s18, 4  ;;  %s1036_s26 = sshra.s32 %s708_s2, 4  ;;  %s1037_s26 = int_to_ptr.hbm [resolvable:$true] %s1036_s26 }
  0x2f   : > { %890 = vmatpush.xpose.msk.msra.mxu0 %vm416_vm1, %v407_v14  ;;  %v393_v50 = vld [vmem:[%s387_s30] sm:$0xff]  ;;  %s1499_s28 = scalar_lea.vmem [#allocation4], %s1586_s20  ;;  %s1038_s29 = scalar_lea.hbm %s1037_s26, 8 }
  0x30   : > { %v1020_v51 = vld [vmem:[%s1579_s6] ss:$0 sm:$0xff]  ;;  %s719_s11 = sshll.u32 %s1499_s28, 4  ;;  %p1039_p11 = scmp.ne.s32.totalorder %s1037_s26, %s1038_s29  ;;  %s1508_s11 = int_to_ptr.vmem [resolvable:$true] %s719_s11 }
  0x31   : > { %926 = vmatpush.xpose.msk.msra.mxu2 %vm509_vm0, %v599_v15  ;;  %v1021_v52 = vld [vmem:[%s1578_s5] ss:$0 sm:$0xff]  ;;  %p1043_p0 = scmp.lt.s32.totalorder %s1037_s26, %s1581_s8  ;;  %p1044_p1 = scmp.lt.s32.totalorder %s1042_s25, %s1038_s29 }
  0x32   : > { %957 = vmatpush.xpose.msk.msra.mxu3 %vm509_vm0, %v499_v16  ;;  %908 = vmatpush.xpose.msk.msra.mxu1 %vm509_vm0, %v499_v16  ;;  %v1019_v56 = vld [vmem:[%s1580_s7] ss:$0 sm:$0xff]  ;;  %p1040_p12 = pnand %p1039_p11, %p1243_p5 }
  0x33   : > { %891 = vmatpush.xpose.msk.msra.mxu0 %vm416_vm1, %v406_v17  ;;  %p1045_p2 = por %p1044_p1, %p1043_p0 }
  0x34   : > { %p1041_p13 = pneg %p1040_p12 }
  0x35   : > { %927 = vmatpush.xpose.msk.msra.mxu2 %vm509_vm0, %v598_v18 }
  0x36   : > { %958 = vmatpush.xpose.msk.msra.mxu3 %vm509_vm0, %v498_v19  ;;  %909 = vmatpush.xpose.msk.msra.mxu1 %vm509_vm0, %v498_v19  ;;  %p1046_p3 = pnand %p1045_p2, %p1041_p13 }
  0x37   : > { %892 = vmatpush.xpose.msk.msra.mxu0 %vm416_vm1, %v405_v20 }
  0x39   : > { %928 = vmatpush.xpose.msk.msra.mxu2 %vm509_vm0, %v597_v21 }
  0x3a   : > { %959 = vmatpush.xpose.msk.msra.mxu3 %vm509_vm0, %v497_v22  ;;  %910 = vmatpush.xpose.msk.msra.mxu1 %vm509_vm0, %v497_v22 }
  0x3b   : > { %893 = vmatpush.xpose.msk.msra.mxu0 %vm416_vm1, %v404_v23 }
  0x3d   : > { %929 = vmatpush.xpose.msk.msra.mxu2 %vm509_vm0, %v596_v24 }
  0x3e   : > { %960 = vmatpush.xpose.msk.msra.mxu3 %vm509_vm0, %v496_v25  ;;  %911 = vmatpush.xpose.msk.msra.mxu1 %vm509_vm0, %v496_v25 }
  0x3f   : > { %894 = vmatpush.xpose.msk.msra.mxu0 %vm416_vm1, %v403_v26 }
  0x41   : > { %930 = vmatpush.xpose.msk.msra.mxu2 %vm509_vm0, %v595_v27 }
  0x42   : > { %961 = vmatpush.xpose.msk.msra.mxu3 %vm509_vm0, %v495_v28  ;;  %912 = vmatpush.xpose.msk.msra.mxu1 %vm509_vm0, %v495_v28 }
  0x43   : > { %895 = vmatpush.xpose.msk.msra.mxu0 %vm416_vm1, %v402_v29 }
  0x45   : > { %931 = vmatpush.xpose.msk.msra.mxu2 %vm509_vm0, %v594_v30 }
  0x46   : > { %962 = vmatpush.xpose.msk.msra.mxu3 %vm509_vm0, %v494_v31  ;;  %913 = vmatpush.xpose.msk.msra.mxu1 %vm509_vm0, %v494_v31 }
  0x47   : > { %896 = vmatpush.xpose.msk.msra.mxu0 %vm416_vm1, %v401_v32 }
  0x49   : > { %932 = vmatpush.xpose.msk.msra.mxu2 %vm509_vm0, %v593_v33 }
  0x4a   : > { %963 = vmatpush.xpose.msk.msra.mxu3 %vm509_vm0, %v493_v34  ;;  %914 = vmatpush.xpose.msk.msra.mxu1 %vm509_vm0, %v493_v34 }
  0x4b   : > { %897 = vmatpush.xpose.msk.msra.mxu0 %vm416_vm1, %v400_v35 }
  0x4d   : > { %933 = vmatpush.xpose.msk.msra.mxu2 %vm509_vm0, %v592_v36 }
  0x4e   : > { %964 = vmatpush.xpose.msk.msra.mxu3 %vm509_vm0, %v492_v37  ;;  %915 = vmatpush.xpose.msk.msra.mxu1 %vm509_vm0, %v492_v37 }
  0x4f   : > { %898 = vmatpush.xpose.msk.msra.mxu0 %vm416_vm1, %v399_v38 }
  0x51   : > { %934 = vmatpush.xpose.msk.msra.mxu2 %vm509_vm0, %v591_v39 }
  0x52   : > { %965 = vmatpush.xpose.msk.msra.mxu3 %vm509_vm0, %v491_v40  ;;  %916 = vmatpush.xpose.msk.msra.mxu1 %vm509_vm0, %v491_v40 }
  0x53   : > { %899 = vmatpush.xpose.msk.msra.mxu0 %vm416_vm1, %v398_v41 }
  0x55   : > { %935 = vmatpush.xpose.msk.msra.mxu2 %vm509_vm0, %v590_v42 }
  0x56   : > { %966 = vmatpush.xpose.msk.msra.mxu3 %vm509_vm0, %v490_v43  ;;  %917 = vmatpush.xpose.msk.msra.mxu1 %vm509_vm0, %v490_v43 }
  0x57   : > { %900 = vmatpush.xpose.msk.msra.mxu0 %vm416_vm1, %v397_v44 }
  0x59   : > { %936 = vmatpush.xpose.msk.msra.mxu2 %vm509_vm0, %v589_v45 }
  0x5a   : > { %967 = vmatpush.xpose.msk.msra.mxu3 %vm509_vm0, %v489_v46  ;;  %918 = vmatpush.xpose.msk.msra.mxu1 %vm509_vm0, %v489_v46 }
  0x5b   : > { %901 = vmatpush.xpose.msk.msra.mxu0 %vm416_vm1, %v396_v47 }
  0x5c   : > { %937 = vmatmul.msk.f32.vlgmr.msra.gmra.mxu2 %vm509_vm0, %v394_v48 }
  0x5d   : > { %920 = vmatmul.msk.f32.vlgmr.msra.gmra.mxu3 %vm509_vm0, %v395_v49  ;;  %919 = vmatmul.msk.f32.vlgmr.msra.gmra.mxu1 %vm509_vm0, %v394_v48 }
  0x5e   : > { %902 = vmatmul.msk.f32.vlgmr.msra.gmra.mxu0 %vm416_vm1, %v393_v50 }
  0x64   : > { %938 = vmatmul.msk.f32.gmra.mxu2 %vm509_vm0, %v395_v49 }
  0xda   : > { %v581_v53 = vpop.f32.mrf.mxu1 }
  0xdb   : > { %v582_v54 = vadd.f32 %v1020_v51, %v581_v53  ;;  %v485_v55 = vpop.f32.mrf.mxu0 }
  0xdc   : > { %v486_v57 = vadd.f32 %v1021_v52, %v485_v55 }
  0xdd   : > { %587 = vst [vmem:[%s1499_s28] sm:$0xff] %v582_v54 }
  0xde   : > { %488 = vst [vmem:[%s369_s0] sm:$0xff] %v486_v57 }
  0xdf   : > { %v674_v58 = vpop.f32.mrf.mxu2 }
  0xe0   : > { %v584_v59 = vpop.f32.mrf.mxu3 }
  0xe1   : > { %1049 = shalt.err (!%p1046_p3)
}
  0xe2   : > { %968 = dma.vmem_to_hbm [thread:$0]  (%p1243_p5), %s706_s1, 128, %s708_s2, %s683_s12   ;;  %v675_v60 = vadd.f32 %v1019_v56, %v674_v58  ;;  %v585_v61 = vadd.f32 %v1020_v51, %v584_v59 }
  0xe3   : > { %s1600_s0 = sshll.u32 %s1475_s18, 4  ;;  %s1601_s30 = sshll.u32 %s1224_s17, 4 }
  0xe4   : > { %s383_s21 = scalar_lea.vmem [#allocation6], %s1600_s0  ;;  %s735_s26 = scalar_lea.hbm %s1583_s10, %s1601_s30  ;;  %588 = vst [vmem:[%s1499_s28 + $0x8] sm:$0xff] %v585_v61 }
  0xe5   : > { %680 = vst [vmem:[%s383_s21] sm:$0xff] %v675_v60  ;;  %s1529_s29 = scalar_lea.sflag [#allocation5], %s687_s3  ;;  %s1064_s22 = sshra.s32 %s722_s4, 4  ;;  %s1065_s22 = int_to_ptr.hbm [resolvable:$true] %s1064_s22 }
  0xe6   : > { %s1066_s25 = scalar_lea.hbm %s1065_s22, 16  ;;  %s1070_s18 = scalar_lea.hbm %s1582_s9, 32 }
  0xe7   : > { %p1067_p4 = scmp.ne.s32.totalorder %s1065_s22, %s1066_s25  ;;  %p1071_p9 = scmp.lt.s32.totalorder %s1065_s22, %s1582_s9 }
  0xe8   : > { %p1072_p10 = scmp.lt.s32.totalorder %s1070_s18, %s1066_s25 }
  0xe9   : > { %p1068_p7 = pnand %p1067_p4, %p1243_p5 }
  0xea   : > { %p1073_p11 = por %p1072_p10, %p1071_p9 }
  0xeb   : > { %p1069_p8 = pneg %p1068_p7 }
  0xed   : > { %p1074_p12 = pnand %p1073_p11, %p1069_p8 }
  0xef   : > { %1077 = shalt.err (!%p1074_p12)
}
  0xf0   : > { %s1146_s28 = smov 128   ;;  %s1147_s3 = smov 8   ;;  %v677_v62 = vpop.f32.mrf.mxu2 }
  0xf1   : > { %969 = dma.vmem_to_hbm [thread:$0]  (%p1243_p5), %s1508_s11, 256, %s722_s4, %s1529_s29, %s1146_s28, %s1146_s28, %s1147_s3   ;;  %v678_v63 = vadd.f32 %v1019_v56, %v677_v62 }
  0xf2   : > { %s736_s0 = sshll.u32 %s383_s21, 4  ;;  %s738_s30 = sshll.u32 %s735_s26, 4  ;;  %s737_s0 = int_to_ptr.vmem [resolvable:$true] %s736_s0  ;;  %s739_s30 = int_to_ptr.hbm [resolvable:$true] %s738_s30 }
  0xf3   : > { %681 = vst [vmem:[%s383_s21 + $0x8] sm:$0xff] %v678_v63  ;;  %s1092_s20 = sshra.s32 %s739_s30, 4  ;;  %s1098_s1 = scalar_lea.hbm %s1583_s10, 32  ;;  %s1093_s20 = int_to_ptr.hbm [resolvable:$true] %s1092_s20 }
  0xf4   : > { %s1094_s27 = scalar_lea.hbm %s1093_s20, 16  ;;  %p1099_p2 = scmp.lt.s32.totalorder %s1093_s20, %s1583_s10 }
  0xf5   : > { %p1095_p13 = scmp.ne.s32.totalorder %s1093_s20, %s1094_s27  ;;  %p1100_p3 = scmp.lt.s32.totalorder %s1098_s1, %s1094_s27 }
  0xf7   : > { %p1096_p0 = pnand %p1095_p13, %p1243_p5  ;;  %p1101_p4 = por %p1100_p3, %p1099_p2 }
  0xf9   : > { %p1097_p1 = pneg %p1096_p0 }
  0xfb   : > { %p1102_p7 = pnand %p1101_p4, %p1097_p1 }
  0xfd   : > { %1105 = shalt.err (!%p1102_p7)
}
  0xfe   : > { %970 = dma.vmem_to_hbm [thread:$0]  (%p1243_p5), %s737_s0, 256, %s739_s30, %s1529_s29, %s1146_s28, %s1146_s28, %s1147_s3  }
  0xff PF: > { %p984_p8 = scmp.ge.s32.totalorder %s1144_s16, 2  ;;  %s753_s4 = sand.u32 1, %s1132_s13  }
 0x100   : > { %s754_s21 = scalar_lea.sflag [#allocation3], %s753_s4 }
 0x101   : > { %p975_p9 = pnand %p984_p8, %p1247_p6 }
 0x103   : > { %p976_p10 = pneg %p975_p9 }
 0x105   : > { %1123 = dma.done.wait (%p976_p10), %s754_s21, 128  }
 0x106   : > { %1125 = vsyncadd (%p976_p10), %s754_s21, 4294967168  ;;  %s1602_s26 = sadd.s32 4294967294, %s1144_s16  }
 0x107   : > { %s763_s18 = sand.u32 1, %s1602_s26  }
 0x108   : > { %s764_s12 = scalar_lea.sflag [#allocation5], %s763_s18 }
 0x109   : > { %1127 = dma.done.wait (%p976_p10), %s764_s12, 512  }
 0x10a   : > { %1129 = vsyncadd (%p976_p10), %s764_s12, 4294966784  ;;  %s1603_s23 = sld [smem:[#allocation9_spill]]  ;;  %p24_p5 = scmp.ge.s32.totalorder %s1228_s19, 4  }
 0x10b   : > { %s1604_s13 = smov %s1136_s14  ;;  %s1605_s14 = smov %s1140_s15 }
 0x10c   : > { %s1607_s16 = smov %s1228_s19  ;;  %26 = sbr.rel (!%p24_p5) target bundleno = 11 (0xb), region = 122 }
 0x110   : > { %s1606_s15 = smov %s1603_s23 }
 0x111   :  { %780 = vsyncpa [#allocation3], 1 }
 0x112   :  { %782 = vsyncpa [#allocation3 + $0x1], 1 }
 0x113   :  { %783 = vsyncpa [#allocation5], 1 }
 0x114   :  { %785 = vsyncpa [#allocation5 + $0x1], 1 }

</bundles_post_ra>
